<compile_context>
chip_gen: v7x
topology: tpu7x:2x2x1
jax: 0.10.0
libtpu: 0.0.40
codegen_flags: <defaults>
</compile_context>

<pallas_src>
import jax
import jax.numpy as jnp
from jax.experimental import pallas as pl
from jax.experimental.pallas import tpu as pltpu

_MIN_LANE = 128


def _swish_kernel(x_ref, o_ref):
    x = x_ref[...]
    xf = x.astype(jnp.float32)
    sig = 1.0 / (1.0 + jnp.exp(-xf))          # exp on EUP; divide/mul on VPU
    o_ref[...] = (xf * sig).astype(o_ref.dtype)


def _swish_2d(x2d: jax.Array, row_tile: int) -> jax.Array:
    rows, lane = x2d.shape
    n = rows * lane
    itemsize = jnp.dtype(x2d.dtype).itemsize
    cost = pl.CostEstimate(
        flops=4 * n, transcendentals=n, bytes_accessed=2 * n * itemsize
    )
    return pl.pallas_call(
        _swish_kernel,
        out_shape=jax.ShapeDtypeStruct((rows, lane), x2d.dtype),
        grid_spec=pltpu.PrefetchScalarGridSpec(
            num_scalar_prefetch=0,
            grid=(pl.cdiv(rows, row_tile),),
            in_specs=[pl.BlockSpec((row_tile, lane), lambda i: (i, 0))],
            out_specs=pl.BlockSpec((row_tile, lane), lambda i: (i, 0)),
        ),
        compiler_params=pltpu.CompilerParams(
            dimension_semantics=("parallel",),
            vmem_limit_bytes=32 * 1024 * 1024,
        ),
        cost_estimate=cost,
    )(x2d)


def _pick_lane(n_aligned: int) -> int:
    for lane in (1024, 512, 256, 128):
        if n_aligned % lane == 0:
            return lane
    return _MIN_LANE


def swish_v2(feat: jax.Array, *, block_bytes: int = 2 * 1024 * 1024) -> jax.Array:
    """Forward of SwishV2: feat * sigmoid(feat), any shape/dtype.

    Computes in f32 and rounds once for sub-32-bit dtypes (matches the f32
    reference more closely than a bf16 sigmoid would).
    """
    orig_shape = feat.shape
    dtype = feat.dtype
    n = feat.size
    if n == 0:
        return feat
    itemsize = jnp.dtype(dtype).itemsize

    flat = jnp.ravel(feat)
    n_aligned = (n // _MIN_LANE) * _MIN_LANE

    parts = []
    if n_aligned > 0:
        lane = _pick_lane(n_aligned)
        rows = n_aligned // lane
        # Sublane pack: 8 rows for 4-byte, 16 for 2-byte, 32 for 1-byte dtypes.
        min_sub = max(8, 32 // itemsize)
        target_rows = (block_bytes // (lane * itemsize)) // min_sub * min_sub
        target_rows = max(min_sub, target_rows)
        if rows <= target_rows:
            row_tile = rows            # block == full array dims (always legal)
        else:
            row_tile = target_rows     # multiple of sublane pack; last block may be partial
        x2d = flat[:n_aligned].reshape(rows, lane)
        parts.append(_swish_2d(x2d, row_tile).reshape(-1))

    if n_aligned != n:
        # <128-element tail: plain jnp, avoids any full-tensor pad/copy.
        tail = flat[n_aligned:].astype(jnp.float32)
        parts.append((tail * jax.nn.sigmoid(tail)).astype(dtype))

    out_flat = parts[0] if len(parts) == 1 else jnp.concatenate(parts)
    return out_flat.reshape(orig_shape)


if __name__ == "__main__":
    key = jax.random.PRNGKey(0)
    # NCHW input consistent with a typical conv activation.
    x = jax.random.normal(key, (2, 4, 16, 16), dtype=jnp.float32)

    out = jax.block_until_ready(swish_v2(x))
    ref = x * jax.nn.sigmoid(x)
    assert out.shape == x.shape and out.dtype == x.dtype
    assert jnp.allclose(out, ref, atol=1e-6, rtol=1e-6)

    # Size not a multiple of 128 — exercises the jnp tail path.
    y = jax.random.normal(jax.random.PRNGKey(1), (3, 5, 7, 11), dtype=jnp.float32)
    out_y = jax.block_until_ready(swish_v2(y))
    assert jnp.allclose(out_y, y * jax.nn.sigmoid(y), atol=1e-6, rtol=1e-6)

    # bf16 path (sublane pack = 16 handled automatically).
    z = jax.random.normal(jax.random.PRNGKey(2), (2, 8, 16, 16), dtype=jnp.bfloat16)
    out_z = jax.block_until_ready(swish_v2(z))
    ref_z = (z.astype(jnp.float32) * jax.nn.sigmoid(z.astype(jnp.float32))).astype(jnp.bfloat16)
    assert out_z.dtype == jnp.bfloat16 and jnp.allclose(
        out_z.astype(jnp.float32), ref_z.astype(jnp.float32), atol=1e-2, rtol=1e-2)

    print("KERNEL_OK")
</pallas_src>

<mosaic_0001>
module attributes {stable_mosaic.version = 11 : i64} {
  func.func @_swish_kernel(%arg0: i32, %arg1: memref<2x1024xf32, #tpu.memory_space<vmem>>, %arg2: memref<2x1024xf32, #tpu.memory_space<vmem>>) attributes {dimension_semantics = [#tpu.dimension_semantics<parallel>], iteration_bounds = array<i64: 1>, scalar_prefetch = 0 : i64, scratch_operands = 0 : i64, tpu.core_type = #tpu.core_type<tc>, window_params = [{transform_indices = @transform_0, window_bounds = array<i64: 2, 1024>}, {transform_indices = @transform_1, window_bounds = array<i64: 2, 1024>}]} {
    %c0 = arith.constant 0 : index
    %c0_0 = arith.constant 0 : index
    %0 = vector.load %arg1[%c0, %c0_0] : memref<2x1024xf32, #tpu.memory_space<vmem>>, vector<2x1024xf32>
    %cst = arith.constant 0.000000e+00 : f32
    %1 = vector.broadcast %cst : f32 to vector<2x1024xf32>
    %2 = arith.subf %1, %0 : vector<2x1024xf32>
    %3 = math.exp %2 : vector<2x1024xf32>
    %cst_1 = arith.constant 1.000000e+00 : f32
    %4 = vector.broadcast %cst_1 : f32 to vector<2x1024xf32>
    %5 = arith.addf %4, %3 : vector<2x1024xf32>
    %cst_2 = arith.constant 1.000000e+00 : f32
    %6 = vector.broadcast %cst_2 : f32 to vector<2x1024xf32>
    %7 = arith.divf %6, %5 : vector<2x1024xf32>
    %8 = arith.mulf %0, %7 : vector<2x1024xf32>
    %c0_3 = arith.constant 0 : index
    %c0_4 = arith.constant 0 : index
    %9 = vector.load %arg2[%c0_3, %c0_4] : memref<2x1024xf32, #tpu.memory_space<vmem>>, vector<2x1024xf32>
    tpu.vector_store %arg2[%c0_3, %c0_4], %8 {strides = array<i32>} : memref<2x1024xf32, #tpu.memory_space<vmem>>, vector<2x1024xf32>,
    return
  }
  func.func @transform_0(%arg0: i32) -> (i32, i32) {
    %c0_i32 = arith.constant 0 : i32
    %c0_i32_0 = arith.constant 0 : i32
    return %arg0, %c0_i32 : i32, i32
  }
  func.func @transform_1(%arg0: i32) -> (i32, i32) {
    %c0_i32 = arith.constant 0 : i32
    %c0_i32_0 = arith.constant 0 : i32
    return %arg0, %c0_i32 : i32, i32
  }
}

</mosaic_0001>

<bundles_post_ra>
// kernel: tpu_custom_call.1
= control target key start
LH: loop header
LB: loop body
LE: loop exit
PB: predicated region body
PF: predicated region fallthrough
CT: control target
= control target key end

     0   :  { %6 = vsyncpa [#allocation3], 0  ;;  %s148_s0 = inlined_call_operand.hbm [shape: f32[2,1024], index: 0, kind: input, shape index: {}]   ;;  %s149_s1 = inlined_call_operand.hbm [shape: f32[2,1024], index: 1, kind: output, shape index: {}]  }
   0x1   :  { %7 = vsyncpa [#allocation4], 0  ;;  %s112_s6 = smov [#allocation2]   ;;  %s64_s10 = scalar_lea.hbm %s148_s0, 256 }
   0x2   :  { %s14_s7 = sshll.u32 %s112_s6, 4  ;;  %p65_p0 = scmp.ne.s32.totalorder %s148_s0, %s64_s10  ;;  %s15_s7 = int_to_ptr.vmem [resolvable:$true] %s14_s7 }
   0x3   :  { %p68_p1 = scmp.lt.u32.totalorder %s64_s10, %s148_s0 }
   0x5   :  { %p70_p2 = pnand %p68_p1, %p65_p0 }
   0x7   :  { %73 = shalt.err (!%p70_p2)
}
   0x8   :  { %s74_s15 = scalar_lea.vmem %s15_s7, 256  ;;  %p79_p4 = scmp.lt.s32.totalorder %s15_s7, %s15_s7 }
   0x9   :  { %p75_p3 = scmp.ne.s32.totalorder %s15_s7, %s74_s15  ;;  %p80_p5 = scmp.lt.s32.totalorder %s74_s15, %s74_s15 }
   0xb   :  { %p81_p6 = por %p80_p5, %p79_p4 }
   0xd   :  { %p82_p7 = pnand %p81_p6, %p75_p3 }
   0xf   :  { %85 = shalt.err (!%p82_p7)
}
  0x10   :  { %17 = dma.hbm_to_vmem [thread:$0]  %s148_s0, 256, %s15_s7, [#allocation3]  }
  0x11   :  { %108 = dma.done.wait [#allocation3], 256  }
  0x12   :  { %109 = vsyncadd [#allocation3], 4294967040  ;;  %v21_v0 = vld [vmem:[#allocation2] sm:$0xff]  ;;  %v22_v1 = vld [vmem:[#allocation2 + $0x8] sm:$0xff]  ;;  %s113_s18 = smov [#allocation5]  }
  0x13   :  { %v23_v2 = vsub.f32 0.0, %v21_v0  ;;  %v24_v3 = vsub.f32 0.0, %v22_v1  ;;  %s45_s19 = sshll.u32 %s113_s18, 4  ;;  %s46_s19 = int_to_ptr.vmem [resolvable:$true] %s45_s19 }
  0x14   :  { %s86_s0 = scalar_lea.vmem %s46_s19, 256  ;;  %p91_p9 = scmp.lt.s32.totalorder %s46_s19, %s46_s19 }
  0x15   :  { %v25_v4 = vmul.f32 1.442695, %v23_v2  ;;  %v27_v5 = vmul.f32 1.442695, %v24_v3  ;;  %p87_p8 = scmp.ne.s32.totalorder %s46_s19, %s86_s0  ;;  %p92_p10 = scmp.lt.s32.totalorder %s86_s0, %s86_s0 }
  0x17   :  { %56 = vpow2.f32 %v25_v4  ;;  %p93_p11 = por %p92_p10, %p91_p9 }
  0x18   :  { %58 = vpow2.f32 %v27_v5 }
  0x19   :  { %p94_p12 = pnand %p93_p11, %p87_p8 }
  0x21   :  { %v57_v6 = vpop.eup %56 }
  0x22   :  { %v59_v7 = vpop.eup %58  ;;  %v29_v8 = vadd.f32 1.0, %v57_v6 }
  0x23   :  { %v30_v9 = vadd.f32 1.0, %v59_v7 }
  0x24   :  { %60 = vrcp.f32 %v29_v8 }
  0x25   :  { %62 = vrcp.f32 %v30_v9 }
  0x2e   :  { %v61_v10 = vpop.eup %60 }
  0x2f   :  { %v63_v11 = vpop.eup %62  ;;  %v35_v12 = vmul.f32 %v61_v10, %v21_v0 }
  0x30   :  { %v36_v13 = vmul.f32 %v63_v11, %v22_v1 }
  0x31   :  { %37 = vst [vmem:[#allocation5] sm:$0xff] %v35_v12 }
  0x32   :  { %38 = vst [vmem:[#allocation5 + $0x8] sm:$0xff] %v36_v13 }
  0x33   :  { %97 = shalt.err (!%p94_p12)
}
  0x34   :  { %s98_s22 = scalar_lea.hbm %s149_s1, 256 }
  0x35   :  { %p99_p13 = scmp.ne.s32.totalorder %s149_s1, %s98_s22  ;;  %p102_p0 = scmp.lt.u32.totalorder %s98_s22, %s149_s1 }
  0x37   :  { %p104_p1 = pnand %p102_p0, %p99_p13 }
  0x39   :  { %107 = shalt.err (!%p104_p1)
}
  0x3a   :  { %48 = dma.vmem_to_hbm [thread:$0]  %s46_s19, 256, %s149_s1, [#allocation4]  }
  0x3b   :  { %110 = dma.done.wait [#allocation4], 256  }
  0x3c   :  { %111 = vsyncadd [#allocation4], 4294967040 }
  0x3d   :  { %52 = vsyncpa [#allocation3], 1 }
  0x3e   :  { %53 = vsyncpa [#allocation4], 1 }

</bundles_post_ra>
